<compile_context>
chip_gen: v6e
topology: v6e:2x2x1
jax: 0.10.0
libtpu: 0.0.40
codegen_flags: <defaults>
</compile_context>

<pallas_src>
import functools

import jax
import jax.numpy as jnp
from jax.experimental import pallas as pl
from jax.experimental.pallas import tpu as pltpu


def _flora_embedding_kernel(idx_ref, delta_ref, w_ref, out_ref, *, tb):
    """One grid step: gather `tb` embedding rows and add the constant FLoRA scalar.

    idx_ref   : (B_pad,) int32 token ids, scalar-prefetched into SMEM.
    delta_ref : (1, 1) f32 FLoRA scalar, SMEM.
    w_ref     : (V, E) embedding table, VMEM-resident (constant block index).
    out_ref   : (tb, E) output block.
    """
    base = pl.program_id(0) * tb
    delta = delta_ref[0, 0]                                # hoisted scalar read
    # Gather tb rows via dynamic sublane slices out of the VMEM-resident table and
    # fold the FLoRA scalar into the same store (no second pass over the block).
    for t in range(tb):                                    # static unroll (tb is small)
        tok = idx_ref[base + t]
        row = w_ref[pl.ds(tok, 1), :].astype(jnp.float32)
        out_ref[pl.ds(t, 1), :] = (row + delta).astype(out_ref.dtype)


def flora_embedding_forward(idx, emb_weight, param_g, param_0, scale=1.0, *, tb=8):
    (B,) = idx.shape
    V, E = emb_weight.shape

    # FLoRA delta, hoisted out of the kernel. For the Embedding wrapper this is the
    # whole flora_layer.forward(style='v2'):
    #   tensordot(param_G (r,), param_0 (dims[0]=1, r), [[0],[1]]) -> (1,)   (no transpose)
    delta = scale * jnp.tensordot(param_g, param_0, axes=[[0], [1]])       # (1,)
    delta2d = delta.reshape(1, 1).astype(jnp.float32)                      # f32 SMEM scalar

    # Pad the batch to a multiple of tb (token id 0 is always a valid row); slice after.
    b_pad = pl.cdiv(B, tb) * tb
    idx_pad = jnp.pad(idx.astype(jnp.int32), (0, b_pad - B))

    itemsize = jnp.dtype(emb_weight.dtype).itemsize
    table_bytes = V * E * itemsize
    out_block_bytes = tb * E * itemsize
    # VMEM-resident-table path: keep the (possibly double-buffered) table comfortably
    # under the v7x per-core budget.
    assert table_bytes <= 24 * (1 << 20), (
        "embedding table too large for the VMEM-resident gather path")
    # TODO(synk): for very large vocabularies keep the table in HBM (memory_space=pl.ANY)
    # and gather rows with manually double-buffered per-row async copies instead.
    vmem_limit = int(min(56 << 20, 2 * table_bytes + 8 * out_block_bytes + (4 << 20)))

    kernel = functools.partial(_flora_embedding_kernel, tb=tb)
    out = pl.pallas_call(
        kernel,
        out_shape=jax.ShapeDtypeStruct((b_pad, E), emb_weight.dtype),
        grid_spec=pltpu.PrefetchScalarGridSpec(
            num_scalar_prefetch=1,                  # idx -> SMEM, fed to index_maps too
            grid=(b_pad // tb,),                    # tb tokens per grid step
            in_specs=[
                # FLoRA scalar: untiled, lives in SMEM (no padded VMEM tile, no buffers).
                pl.BlockSpec(memory_space=pltpu.MemorySpace.SMEM),
                # Whole table, constant block index -> fetched once, stays VMEM-resident.
                pl.BlockSpec((V, E), lambda i, idx_ref: (0, 0)),
            ],
            # Sublane-full (tb, E) output blocks -> dense, lane-dense writeback.
            out_specs=pl.BlockSpec((tb, E), lambda i, idx_ref: (i, 0)),
        ),
        compiler_params=pltpu.CompilerParams(
            dimension_semantics=("parallel",),      # shard batch axis across TCs (v7x)
            vmem_limit_bytes=vmem_limit),
    )(idx_pad, delta2d, emb_weight)
    return out[:B]


if __name__ == "__main__":
    key = jax.random.PRNGKey(0)
    k1, k2, k3, k4 = jax.random.split(key, 4)

    # Small shapes consistent with the module: nn.Embedding(V, E), flora N=1, r=[8].
    B, V, E, r = 19, 64, 256, 8      # B not a multiple of 8 -> exercises the padding path
    scale = 1.0

    idx = jax.random.randint(k1, (B,), 0, V, dtype=jnp.int32)
    emb_weight = jax.random.normal(k2, (V, E), dtype=jnp.float32)   # base nn.Embedding.weight
    # FLoRALayer params: param_G: (r,), param_0: (dims[0]=1, r).
    # NOTE: the module's init_parameters() zeroes param_G (flora path would be exactly 0);
    # we use deterministic random values so the flora contribution is exercised.
    param_g = jax.random.normal(k3, (r,), dtype=jnp.float32)
    param_0 = jax.random.normal(k4, (1, r), dtype=jnp.float32)

    out = flora_embedding_forward(idx, emb_weight, param_g, param_0, scale)
    out = jax.block_until_ready(out)

    # Pure-JAX reference of the PyTorch forward.
    new_weight = scale * jnp.tensordot(param_g, param_0, axes=[[0], [1]])   # (1,)
    flora_out = jnp.tile(new_weight[None, :], (B, 1))                        # (B, 1)
    ref = emb_weight[idx] + flora_out                                        # (B, E)

    assert out.shape == (B, E) and out.dtype == ref.dtype
    assert jnp.allclose(out, ref, atol=1e-5, rtol=1e-5)
    print("KERNEL_OK")
</pallas_src>

<mosaic_0001>
module attributes {stable_mosaic.version = 11 : i64} {
  func.func @_flora_embedding_kernel(%arg0: i32, %arg1: memref<24xi32, #tpu.memory_space<smem>>, %arg2: memref<1x1xf32, #tpu.memory_space<smem>>, %arg3: memref<64x256xf32, #tpu.memory_space<vmem>>, %arg4: memref<8x256xf32, #tpu.memory_space<vmem>>) attributes {dimension_semantics = [#tpu.dimension_semantics<parallel>], iteration_bounds = array<i64: 3>, scalar_prefetch = 1 : i64, scratch_operands = 0 : i64, tpu.core_type = #tpu.core_type<tc>, window_params = [{transform_indices = @transform_0, window_bounds = array<i64: 1, 1>}, {pipeline_mode = #tpu.pipeline_mode<synchronous>, transform_indices = @transform_1, window_bounds = array<i64: 64, 256>}, {transform_indices = @transform_2, window_bounds = array<i64: 8, 256>}]} {
    %c8_i32 = arith.constant 8 : i32
    %0 = arith.muli %arg0, %c8_i32 : i32
    %c0 = arith.constant 0 : index
    %c0_0 = arith.constant 0 : index
    %1 = memref.load %arg2[%c0, %c0_0] : memref<1x1xf32, #tpu.memory_space<smem>>
    %c0_i32 = arith.constant 0 : i32
    %2 = arith.addi %0, %c0_i32 : i32
    %3 = arith.index_cast %2 : i32 to index
    %4 = memref.load %arg1[%3] : memref<24xi32, #tpu.memory_space<smem>>
    %5 = arith.index_cast %4 : i32 to index
    %c0_1 = arith.constant 0 : index
    %6 = vector.load %arg3[%5, %c0_1] : memref<64x256xf32, #tpu.memory_space<vmem>>, vector<1x256xf32>
    %7 = vector.broadcast %1 : f32 to vector<1x256xf32>
    %8 = arith.addf %6, %7 : vector<1x256xf32>
    %c0_2 = arith.constant 0 : index
    %c0_3 = arith.constant 0 : index
    %9 = vector.load %arg4[%c0_2, %c0_3] : memref<8x256xf32, #tpu.memory_space<vmem>>, vector<1x256xf32>
    tpu.vector_store %arg4[%c0_2, %c0_3], %8 {strides = array<i32>} : memref<8x256xf32, #tpu.memory_space<vmem>>, vector<1x256xf32>,
    %c1_i32 = arith.constant 1 : i32
    %10 = arith.addi %0, %c1_i32 : i32
    %11 = arith.index_cast %10 : i32 to index
    %12 = memref.load %arg1[%11] : memref<24xi32, #tpu.memory_space<smem>>
    %13 = arith.index_cast %12 : i32 to index
    %c0_4 = arith.constant 0 : index
    %14 = vector.load %arg3[%13, %c0_4] : memref<64x256xf32, #tpu.memory_space<vmem>>, vector<1x256xf32>
    %15 = vector.broadcast %1 : f32 to vector<1x256xf32>
    %16 = arith.addf %14, %15 : vector<1x256xf32>
    %c1 = arith.constant 1 : index
    %c0_5 = arith.constant 0 : index
    %17 = vector.load %arg4[%c1, %c0_5] : memref<8x256xf32, #tpu.memory_space<vmem>>, vector<1x256xf32>
    tpu.vector_store %arg4[%c1, %c0_5], %16 {strides = array<i32>} : memref<8x256xf32, #tpu.memory_space<vmem>>, vector<1x256xf32>,
    %c2_i32 = arith.constant 2 : i32
    %18 = arith.addi %0, %c2_i32 : i32
    %19 = arith.index_cast %18 : i32 to index
    %20 = memref.load %arg1[%19] : memref<24xi32, #tpu.memory_space<smem>>
    %21 = arith.index_cast %20 : i32 to index
    %c0_6 = arith.constant 0 : index
    %22 = vector.load %arg3[%21, %c0_6] : memref<64x256xf32, #tpu.memory_space<vmem>>, vector<1x256xf32>
    %23 = vector.broadcast %1 : f32 to vector<1x256xf32>
    %24 = arith.addf %22, %23 : vector<1x256xf32>
    %c2 = arith.constant 2 : index
    %c0_7 = arith.constant 0 : index
    %25 = vector.load %arg4[%c2, %c0_7] : memref<8x256xf32, #tpu.memory_space<vmem>>, vector<1x256xf32>
    tpu.vector_store %arg4[%c2, %c0_7], %24 {strides = array<i32>} : memref<8x256xf32, #tpu.memory_space<vmem>>, vector<1x256xf32>,
    %c3_i32 = arith.constant 3 : i32
    %26 = arith.addi %0, %c3_i32 : i32
    %27 = arith.index_cast %26 : i32 to index
    %28 = memref.load %arg1[%27] : memref<24xi32, #tpu.memory_space<smem>>
    %29 = arith.index_cast %28 : i32 to index
    %c0_8 = arith.constant 0 : index
    %30 = vector.load %arg3[%29, %c0_8] : memref<64x256xf32, #tpu.memory_space<vmem>>, vector<1x256xf32>
    %31 = vector.broadcast %1 : f32 to vector<1x256xf32>
    %32 = arith.addf %30, %31 : vector<1x256xf32>
    %c3 = arith.constant 3 : index
    %c0_9 = arith.constant 0 : index
    %33 = vector.load %arg4[%c3, %c0_9] : memref<8x256xf32, #tpu.memory_space<vmem>>, vector<1x256xf32>
    tpu.vector_store %arg4[%c3, %c0_9], %32 {strides = array<i32>} : memref<8x256xf32, #tpu.memory_space<vmem>>, vector<1x256xf32>,
    %c4_i32 = arith.constant 4 : i32
    %34 = arith.addi %0, %c4_i32 : i32
    %35 = arith.index_cast %34 : i32 to index
    %36 = memref.load %arg1[%35] : memref<24xi32, #tpu.memory_space<smem>>
    %37 = arith.index_cast %36 : i32 to index
    %c0_10 = arith.constant 0 : index
    %38 = vector.load %arg3[%37, %c0_10] : memref<64x256xf32, #tpu.memory_space<vmem>>, vector<1x256xf32>
    %39 = vector.broadcast %1 : f32 to vector<1x256xf32>
    %40 = arith.addf %38, %39 : vector<1x256xf32>
    %c4 = arith.constant 4 : index
    %c0_11 = arith.constant 0 : index
    %41 = vector.load %arg4[%c4, %c0_11] : memref<8x256xf32, #tpu.memory_space<vmem>>, vector<1x256xf32>
    tpu.vector_store %arg4[%c4, %c0_11], %40 {strides = array<i32>} : memref<8x256xf32, #tpu.memory_space<vmem>>, vector<1x256xf32>,
    %c5_i32 = arith.constant 5 : i32
    %42 = arith.addi %0, %c5_i32 : i32
    %43 = arith.index_cast %42 : i32 to index
    %44 = memref.load %arg1[%43] : memref<24xi32, #tpu.memory_space<smem>>
    %45 = arith.index_cast %44 : i32 to index
    %c0_12 = arith.constant 0 : index
    %46 = vector.load %arg3[%45, %c0_12] : memref<64x256xf32, #tpu.memory_space<vmem>>, vector<1x256xf32>
    %47 = vector.broadcast %1 : f32 to vector<1x256xf32>
    %48 = arith.addf %46, %47 : vector<1x256xf32>
    %c5 = arith.constant 5 : index
    %c0_13 = arith.constant 0 : index
    %49 = vector.load %arg4[%c5, %c0_13] : memref<8x256xf32, #tpu.memory_space<vmem>>, vector<1x256xf32>
    tpu.vector_store %arg4[%c5, %c0_13], %48 {strides = array<i32>} : memref<8x256xf32, #tpu.memory_space<vmem>>, vector<1x256xf32>,
    %c6_i32 = arith.constant 6 : i32
    %50 = arith.addi %0, %c6_i32 : i32
    %51 = arith.index_cast %50 : i32 to index
    %52 = memref.load %arg1[%51] : memref<24xi32, #tpu.memory_space<smem>>
    %53 = arith.index_cast %52 : i32 to index
    %c0_14 = arith.constant 0 : index
    %54 = vector.load %arg3[%53, %c0_14] : memref<64x256xf32, #tpu.memory_space<vmem>>, vector<1x256xf32>
    %55 = vector.broadcast %1 : f32 to vector<1x256xf32>
    %56 = arith.addf %54, %55 : vector<1x256xf32>
    %c6 = arith.constant 6 : index
    %c0_15 = arith.constant 0 : index
    %57 = vector.load %arg4[%c6, %c0_15] : memref<8x256xf32, #tpu.memory_space<vmem>>, vector<1x256xf32>
    tpu.vector_store %arg4[%c6, %c0_15], %56 {strides = array<i32>} : memref<8x256xf32, #tpu.memory_space<vmem>>, vector<1x256xf32>,
    %c7_i32 = arith.constant 7 : i32
    %58 = arith.addi %0, %c7_i32 : i32
    %59 = arith.index_cast %58 : i32 to index
    %60 = memref.load %arg1[%59] : memref<24xi32, #tpu.memory_space<smem>>
    %61 = arith.index_cast %60 : i32 to index
    %c0_16 = arith.constant 0 : index
    %62 = vector.load %arg3[%61, %c0_16] : memref<64x256xf32, #tpu.memory_space<vmem>>, vector<1x256xf32>
    %63 = vector.broadcast %1 : f32 to vector<1x256xf32>
    %64 = arith.addf %62, %63 : vector<1x256xf32>
    %c7 = arith.constant 7 : index
    %c0_17 = arith.constant 0 : index
    %65 = vector.load %arg4[%c7, %c0_17] : memref<8x256xf32, #tpu.memory_space<vmem>>, vector<1x256xf32>
    tpu.vector_store %arg4[%c7, %c0_17], %64 {strides = array<i32>} : memref<8x256xf32, #tpu.memory_space<vmem>>, vector<1x256xf32>,
    return
  }
  func.func @transform_0(%arg0: i32, %arg1: memref<24xi32, #tpu.memory_space<smem>>) -> (i32, i32) {
    %c0_i32 = arith.constant 0 : i32
    %c0_i32_0 = arith.constant 0 : i32
    %c0_i32_1 = arith.constant 0 : i32
    return %c0_i32, %c0_i32_0 : i32, i32
  }
  func.func @transform_1(%arg0: i32, %arg1: memref<24xi32, #tpu.memory_space<smem>>) -> (i32, i32) {
    %c0_i32 = arith.constant 0 : i32
    %c0_i32_0 = arith.constant 0 : i32
    %c0_i32_1 = arith.constant 0 : i32
    return %c0_i32, %c0_i32_0 : i32, i32
  }
  func.func @transform_2(%arg0: i32, %arg1: memref<24xi32, #tpu.memory_space<smem>>) -> (i32, i32) {
    %c0_i32 = arith.constant 0 : i32
    %c0_i32_0 = arith.constant 0 : i32
    return %arg0, %c0_i32 : i32, i32
  }
}

</mosaic_0001>

<bundles_post_ra>
// kernel: tpu_custom_call.1
= control target key start
LH: loop header
LB: loop body
LE: loop exit
PB: predicated region body
PF: predicated region fallthrough
CT: control target
= control target key end

     0   :  { %s777_s0 = inlined_call_operand.vmem [shape: s32[24], index: 0, kind: input, shape index: {}]   ;;  %s778_s1 = inlined_call_operand.<no memory space> [shape: f32[1,1], index: 1, kind: input, shape index: {}]   ;;  %s779_s2 = inlined_call_operand.hbm [shape: f32[64,256], index: 2, kind: input, shape index: {}]   ;;  %s780_s3 = inlined_call_operand.hbm [shape: f32[24,256], index: 3, kind: output, shape index: {}]  }
   0x1   :  { %s8_s14 = sshll.u32 %s777_s0, 4  ;;  %12 = sst [smem:[#allocation4]] %s778_s1  ;;  %s9_s14 = int_to_ptr.vmem [resolvable:$true] %s8_s14 }
   0x2   :  { %s465_s17 = scalar_lea.vmem %s9_s14, 16  ;;  %p470_p1 = scmp.lt.s32.totalorder %s9_s14, %s9_s14 }
   0x3   :  { %p466_p0 = scmp.ne.s32.totalorder %s9_s14, %s465_s17  ;;  %p471_p2 = scmp.lt.s32.totalorder %s465_s17, %s465_s17 }
   0x5   :  { %p472_p3 = por %p471_p2, %p470_p1 }
   0x7   :  { %p473_p4 = pnand %p472_p3, %p466_p0 }
   0x9   :  { %476 = shalt.err (!%p473_p4)  }
   0xa   :  { %s571_s18 = smov [#allocation3]  }
   0xb   :  { %11 = dma.vmem_to_smem %s9_s14, 16, %s571_s18, [#allocation2] }
   0xc   :  { %545 = dma.done.wait [#allocation2], 16 }
   0xd   :  { %546 = vsyncadd [#allocation2], 4294967280 }
   0xe   :  { %14 = sfence }
   0xf   :  { %15 = vsyncpa [#allocation6], 0 }
  0x10   :  { %16 = vsyncpa [#allocation7], 0 }
  0x11   :  { %18 = vsyncpa [#allocation7 + $0x1], 0  ;;  %s602_s0 = smov 0   ;;  %s604_s19 = smov 0  }
  0x12   :  { %s606_s1 = smov 0   ;;  %s608_s20 = smov 0  }
  0x13 LB: > { %s623_s21 = sadd.s32 4294967295, %s569_s20   ;;  %s368_s22 = sadd.s32 4294967294, %s569_s20   ;;  %s569_s20 = sphi %s608_s20, %s790_s20   ;;  %s565_s1 = sphi %s606_s1, %s789_s1   ;;  %s561_s19 = sphi %s604_s19, %s788_s19   ;;  %s557_s0 = sphi %s602_s0, %s787_s0  }
  0x14   : > { %s627_s23 = sadd.s32 1, %s569_s20   ;;  %s73_s24 = sadd.s32 1, %s565_s1 }
  0x15   : > { %s70_s25 = ssub.s32 %s569_s20, %s627_s23  ;;  %p83_p5 = scmp.ne.s32.totalorder %s565_s1, %s561_s19 }
  0x16   : > { %p71_p6 = scmp.eq.s32.totalorder %s70_s25, 0  ;;  %p84_p7 = scmp.eq.s32.totalorder %s623_s21, 2 }
  0x17   : > { %p89_p8 = scmp.ne.s32.totalorder %s561_s19, %s557_s0  ;;  %p90_p9 = scmp.eq.s32.totalorder %s368_s22, 2 }
  0x18   : > { %s638_s26 = scalar_select %p71_p6, %s565_s1, %s73_s24  }
  0x19   : > { %p640_p10 = por %p84_p7, %p83_p5  ;;  %p644_p11 = por %p90_p9, %p89_p8 }
  0x1a   : > { %p369_p12 = scmp.ge.s32.totalorder %s569_s20, 1  ;;  %p97_p13 = scmp.lt.s32.totalorder %s569_s20, 4 }
  0x1b   : > { %s782_s28 = scalar_select %p644_p11, 1, 0 }
  0x1c   : > { %p426_p0 = scmp.eq.s32.totalorder %s623_s21, 0  ;;  %p651_p1 = pnand %p369_p12, %p97_p13 }
  0x1d   : > { %s572_s30 = smov [#allocation5]  }
  0x1e   : > { %s112_s4 = sshll.u32 %s572_s30, 4  ;;  %p418_p2 = pneg %p651_p1  ;;  %s113_s4 = int_to_ptr.vmem [resolvable:$true] %s112_s4 }
  0x1f   : > { %s488_s5 = scalar_lea.vmem %s113_s4, 2048  ;;  %p496_p8 = scmp.lt.s32.totalorder %s113_s4, %s113_s4 }
  0x20   : > { %p419_p3 = pnand %p426_p0, %p418_p2  ;;  %p489_p5 = scmp.ne.s32.totalorder %s113_s4, %s488_s5 }
  0x21   : > { %p497_p9 = scmp.lt.s32.totalorder %s488_s5, %s488_s5 }
  0x22   : > { %p479_p4 = pneg %p419_p3 }
  0x23   : > { %p498_p11 = por %p497_p9, %p496_p8 }
  0x24   : > { %p491_p6 = pnand %p489_p5, %p479_p4 }
  0x26   : > { %p492_p7 = pneg %p491_p6 }
  0x28   : > { %p499_p12 = pnand %p498_p11, %p492_p7 }
  0x2a   : > { %502 = shalt.err (!%p499_p12)
}
  0x2b   : > { %s573_s6 = smov 256   ;;  %s574_s7 = smov 16  }
  0x2c   : > { %421 = dma.hbm_to_vmem [thread:$0]  (!%p419_p3), %s779_s2, 2048, %s113_s4, [#allocation6], %s573_s6, %s573_s6, %s574_s7  }
  0x2d   : > { %128 = sbr.rel (%p651_p1) target bundleno = 108 (0x6c), region = 28 }
  0x32   : > { %548 = dma.done.wait (%p426_p0), [#allocation6], 2048  }
  0x33   : > { %550 = vsyncadd (%p426_p0), [#allocation6], 4294965248  ;;  %s142_s10 = sand.u32 1, %s561_s19   ;;  %s670_s11 = sshll.u32 %s623_s21, 3  ;;  %v159_v0 = vlaneseq }
  0x34   : > { %s674_s12 = sshll.u32 %s142_s10, 4  ;;  %s146_s13 = sld [smem:[#allocation4]] }
  0x35   : > { %s147_s14 = sld [smem:[#allocation3 + %s670_s11]]  ;;  %s165_s15 = sadd.s32 1, %s670_s11  ;;  %vm692_vm0 = vcmp.lt.s32.totalorder %v159_v0, 256 }
  0x36   : > { %s166_s16 = sld [smem:[#allocation3 + %s165_s15]]  ;;  %s180_s17 = sadd.s32 2, %s670_s11 }
  0x37   : > { %s679_s18 = sld [smem:[#allocation3 + %s180_s17]]  ;;  %s195_s22 = sadd.s32 3, %s670_s11 }
  0x38   : > { %s682_s24 = sld [smem:[#allocation3 + %s195_s22]]  ;;  %s210_s25 = sadd.s32 4, %s670_s11 }
  0x39   : > { %s685_s29 = sld [smem:[#allocation3 + %s210_s25]]  ;;  %s225_s30 = sadd.s32 5, %s670_s11 }
  0x3a   : > { %s688_s7 = sld [smem:[#allocation3 + %s225_s30]]  ;;  %v690_v1 = vstv %s146_s13  ;;  %s700_s13 = scalar_lea.vmem [#allocation8], %s674_s12 }
  0x3b   : > { %s148_s4 = sshra.s32 %s147_s14, 3  ;;  %s151_s5 = sand.u32 7, %s147_s14 }
  0x3c   : > { %s403_s6 = sshll.u32 %s148_s4, 4  ;;  %s167_s9 = sshra.s32 %s166_s16, 3 }
  0x3d   : > { %s154_s8 = sadd.s32 %s403_s6, %s151_s5  ;;  %s170_s15 = sand.u32 7, %s166_s16 }
  0x3e   : > { %s155_s17 = scalar_lea.vmem [#allocation5], %s154_s8  ;;  %s404_s22 = sshll.u32 %s167_s9, 4 }
  0x3f   : > { %v156_v2 = vld [vmem:[%s155_s17] ss:$8 sm:$0x3]  ;;  %s182_s14 = sshra.s32 %s679_s18, 3  ;;  %s173_s25 = sadd.s32 %s404_s22, %s170_s15 }
  0x40   : > { %v158_v4 = vadd.f32 %v690_v1, %v156_v2  ;;  %s185_s30 = sand.u32 7, %s679_s18  ;;  %s405_s4 = sshll.u32 %s182_s14, 4 }
  0x41   : > { %s174_s16 = scalar_lea.vmem [#allocation5], %s173_s25  ;;  %s188_s5 = sadd.s32 %s405_s4, %s185_s30 }
  0x42   : > { %163 = vst.msk [vmem:[%s700_s13] ss:$8 sm:$0x3] %vm692_vm0, %v158_v4  ;;  %v175_v5 = vld [vmem:[%s174_s16] ss:$8 sm:$0x3] }
  0x43   : > { %s197_s6 = sshra.s32 %s682_s24, 3  ;;  %v176_v6 = vadd.f32 %v175_v5, %v690_v1  ;;  %s200_s8 = sand.u32 7, %s682_s24 }
  0x44   : > { %s189_s18 = scalar_lea.vmem [#allocation5], %s188_s5  ;;  %s406_s9 = sshll.u32 %s197_s6, 4 }
  0x45   : > { %v190_v7 = vld [vmem:[%s189_s18] ss:$8 sm:$0x3]  ;;  %s212_s12 = sshra.s32 %s685_s29, 3  ;;  %s203_s15 = sadd.s32 %s406_s9, %s200_s8 }
  0x46   : > { %379 = vst.msk [vmem:[%s700_s13 + $0x1] ss:$8 sm:$0x3] %vm692_vm0, %v176_v6  ;;  %v191_v8 = vadd.f32 %v190_v7, %v690_v1  ;;  %s215_s17 = sand.u32 7, %s685_s29  ;;  %s407_s22 = sshll.u32 %s212_s12, 4 }
  0x47   : > { %s204_s24 = scalar_lea.vmem [#allocation5], %s203_s15  ;;  %s218_s14 = sadd.s32 %s407_s22, %s215_s17 }
  0x48   : > { %382 = vst.msk [vmem:[%s700_s13 + $0x2] ss:$8 sm:$0x3] %vm692_vm0, %v191_v8  ;;  %v205_v9 = vld [vmem:[%s204_s24] ss:$8 sm:$0x3] }
  0x49   : > { %s227_s25 = sshra.s32 %s688_s7, 3  ;;  %v206_v10 = vadd.f32 %v205_v9, %v690_v1  ;;  %s230_s30 = sand.u32 7, %s688_s7 }
  0x4a   : > { %s219_s4 = scalar_lea.vmem [#allocation5], %s218_s14  ;;  %s408_s16 = sshll.u32 %s227_s25, 4 }
  0x4b   : > { %v220_v11 = vld [vmem:[%s219_s4] ss:$8 sm:$0x3]  ;;  %s240_s5 = sadd.s32 6, %s670_s11  ;;  %s233_s29 = sadd.s32 %s408_s16, %s230_s30 }
  0x4c   : > { %385 = vst.msk [vmem:[%s700_s13 + $0x3] ss:$8 sm:$0x3] %vm692_vm0, %v206_v10  ;;  %v221_v12 = vadd.f32 %v220_v11, %v690_v1  ;;  %s241_s6 = sld [smem:[#allocation3 + %s240_s5]]  ;;  %s255_s8 = sadd.s32 7, %s670_s11 }
  0x4d   : > { %s234_s18 = scalar_lea.vmem [#allocation5], %s233_s29  ;;  %s256_s7 = sld [smem:[#allocation3 + %s255_s8]] }
  0x4e   : > { %388 = vst.msk [vmem:[%s700_s13 + $0x4] ss:$8 sm:$0x3] %vm692_vm0, %v221_v12  ;;  %v235_v13 = vld [vmem:[%s234_s18] ss:$8 sm:$0x3] }
  0x4f   : > { %v236_v14 = vadd.f32 %v235_v13, %v690_v1  ;;  %s411_s25 = sshll.u32 %s623_s21, 8  ;;  %s285_s4 = sshll.u32 %s700_s13, 4  ;;  %s286_s4 = int_to_ptr.vmem [resolvable:$true] %s285_s4 }
  0x50   : > { %s271_s21 = scalar_lea.sflag [#allocation7], %s142_s10  ;;  %s503_s8 = scalar_lea.vmem %s286_s4, 256 }
  0x51   : > { %391 = vst.msk [vmem:[%s700_s13 + $0x5] ss:$8 sm:$0x3] %vm692_vm0, %v236_v14  ;;  %p504_p11 = scmp.ne.s32.totalorder %s286_s4, %s503_s8  ;;  %s575_s18 = smov [#allocation8]  }
  0x52   : > { %s242_s9 = sshra.s32 %s241_s6, 3  ;;  %s245_s12 = sand.u32 7, %s241_s6 }
  0x53   : > { %s409_s15 = sshll.u32 %s242_s9, 4  ;;  %s257_s11 = sshra.s32 %s256_s7, 3 }
  0x54   : > { %s248_s17 = sadd.s32 %s409_s15, %s245_s12  ;;  %s260_s22 = sand.u32 7, %s256_s7 }
  0x55   : > { %s249_s24 = scalar_lea.vmem [#allocation5], %s248_s17  ;;  %s410_s14 = sshll.u32 %s257_s11, 4 }
  0x56   : > { %v250_v15 = vld [vmem:[%s249_s24] ss:$8 sm:$0x3]  ;;  %s263_s30 = sadd.s32 %s410_s14, %s260_s22  ;;  %s283_s6 = scalar_lea.hbm %s780_s3, %s411_s25 }
  0x57   : > { %v251_v16 = vadd.f32 %v250_v15, %v690_v1  ;;  %s264_s16 = scalar_lea.vmem [#allocation5], %s263_s30  ;;  %p505_p13 = pnand %p504_p11, %p640_p10 }
  0x58   : > { %v265_v17 = vld [vmem:[%s264_s16] ss:$8 sm:$0x3]  ;;  %s507_s7 = sshll.u32 %s575_s18, 4  ;;  %s508_s7 = int_to_ptr.vmem [resolvable:$false] %s507_s7 }
  0x59   : > { %394 = vst.msk [vmem:[%s700_s13 + $0x6] ss:$8 sm:$0x3] %vm692_vm0, %v251_v16  ;;  %v266_v18 = vadd.f32 %v265_v17, %v690_v1  ;;  %p506_p0 = pneg %p505_p13  ;;  %s509_s9 = scalar_lea.vmem %s508_s7, 512 }
  0x5a   : > { %p510_p1 = scmp.lt.s32.totalorder %s286_s4, %s508_s7  ;;  %p511_p2 = scmp.lt.s32.totalorder %s509_s9, %s503_s8 }
  0x5b   : > { %397 = vst.msk [vmem:[%s700_s13 + $0x7] ss:$8 sm:$0x3] %vm692_vm0, %v266_v18 }
  0x5c   : > { %p512_p3 = por %p511_p2, %p510_p1 }
  0x5e   : > { %p513_p4 = pnand %p512_p3, %p506_p0 }
  0x60   : > { %516 = shalt.err (!%p513_p4)
}
  0x61   : > { %s517_s12 = scalar_lea.hbm %s283_s6, 256  ;;  %s521_s15 = scalar_lea.hbm %s780_s3, 768 }
  0x62   : > { %p518_p5 = scmp.ne.s32.totalorder %s283_s6, %s517_s12  ;;  %p522_p8 = scmp.lt.s32.totalorder %s283_s6, %s780_s3 }
  0x63   : > { %p523_p9 = scmp.lt.s32.totalorder %s521_s15, %s517_s12 }
  0x64   : > { %p519_p6 = pnand %p518_p5, %p640_p10 }
  0x65   : > { %p524_p12 = por %p523_p9, %p522_p8 }
  0x66   : > { %p520_p7 = pneg %p519_p6 }
  0x68   : > { %p525_p11 = pnand %p524_p12, %p520_p7 }
  0x6a   : > { %528 = shalt.err (!%p525_p11)
}
  0x6b   : > { %416 = dma.vmem_to_hbm [thread:$0]  (%p640_p10), %s286_s4, 256, %s283_s6, %s271_s21  }
  0x6c PF: > { %p428_p13 = scmp.ge.s32.totalorder %s569_s20, 2  ;;  %s297_s22 = sand.u32 1, %s557_s0  }
  0x6d   : > { %p786_p0 = scmp.ne.s32.totalorder %s782_s28, 0  ;;  %s298_s24 = scalar_lea.sflag [#allocation7], %s297_s22 }
  0x6f   : > { %p423_p1 = pnand %p428_p13, %p786_p0 }
  0x71   : > { %p424_p2 = pneg %p423_p1 }
  0x73   : > { %552 = dma.done.wait (%p424_p2), %s298_s24, 256  }
  0x74   : > { %554 = vsyncadd (%p424_p2), %s298_s24, 4294967040  ;;  %p21_p3 = scmp.ge.s32.totalorder %s627_s23, 5   ;;  %s787_s0 = smov %s561_s19 }
  0x75   : > { %s788_s19 = smov %s565_s1  ;;  %s789_s1 = smov %s638_s26 }
  0x76   : > { %s790_s20 = smov %s627_s23  ;;  %23 = sbr.rel (!%p21_p3) target bundleno = 19 (0x13), region = 80 }
  0x7b   :  { %303 = vsyncpa [#allocation6], 1 }
  0x7c   :  { %305 = vsyncpa [#allocation6 + $0x1], 1 }
  0x7d   :  { %306 = vsyncpa [#allocation7], 1 }
  0x7e   :  { %308 = vsyncpa [#allocation7 + $0x1], 1 }

</bundles_post_ra>
